<compile_context>
chip_gen: v7x
topology: tpu7x:2x2x1
jax: 0.10.0
libtpu: 0.0.40
codegen_flags: <defaults>
</compile_context>

<pallas_src>
import jax
import jax.numpy as jnp
from jax.experimental import pallas as pl
from jax.experimental.pallas import tpu as pltpu


def _round_up(x, m):
    return ((x + m - 1) // m) * m


# ----------------------------------------------------------------------------
# Fused kernel: grid = (num_layers, scale)
# ----------------------------------------------------------------------------
def _fused_eiconv_kernel(h0_ref, e_ref, rain_ref, src_oh_ref, dst_oh_ref,
                         we_ref, wn_ref, wo_ref,
                         rain_out_ref,
                         h_ref):
    l = pl.program_id(0)                 # time step
    s = pl.program_id(1)                 # scale index; s == last -> out_on=True
    last_s = pl.num_programs(1) - 1

    # One-time init: seed the VMEM-resident node state, zero the rain output.
    @pl.when(jnp.logical_and(l == 0, s == 0))
    def _():
        h_ref[...] = h0_ref[...]
        rain_out_ref[...] = jnp.zeros_like(rain_out_ref)

    # Edge gate: activation_edge(e_feat @ W_e)                       [E, H]
    gate = jax.nn.sigmoid(
        jnp.dot(e_ref[0], we_ref[0], preferred_element_type=jnp.float32))

    # Gather source-node features (one-hot matmul; bf16 storage, f32 math).
    # TODO(synk): for large graphs replace the O(E*N) one-hot matmuls with
    # index-based gather/scatter (scalar-prefetched src/dst indices + edge
    # tiling); at demo sizes the dense form is fully VMEM-resident.
    h_src = jnp.dot(src_oh_ref[...].astype(jnp.float32), h_ref[...],
                    preferred_element_type=jnp.float32)              # [E, H]
    msg = gate * h_src
    # Scatter-sum messages onto destination nodes.
    agg = jnp.dot(dst_oh_ref[...].astype(jnp.float32), msg,
                  preferred_element_type=jnp.float32)                # [N, H]

    # Per-node rain forcing + node update.
    z = agg + rain_ref[0]                                            # [N,1] bcast
    h_new = jax.nn.relu(
        jnp.dot(z, wn_ref[0], preferred_element_type=jnp.float32))   # [N, H]
    h_ref[...] = h_new

    # Rain read-out only for the out_on=True layer; accumulate into the
    # lane-padded resident output block (written back to HBM once at the end).
    @pl.when(s == last_s)
    def _():
        rain_m = jnp.dot(h_new, wo_ref[...],
                         preferred_element_type=jnp.float32)         # [N, 1]
        lane = jax.lax.broadcasted_iota(jnp.int32, rain_out_ref.shape, 1)
        rain_out_ref[...] = jnp.where(lane == l, rain_m, rain_out_ref[...])


# ----------------------------------------------------------------------------
# Forward wrapper
# ----------------------------------------------------------------------------
@jax.jit
def st_eiconv_net_forward(inputs, e_feats, rain0, params, src_onehot,
                          dst_onehot):
    """inputs [N,in_dim], e_feats [E,edge_dim,L], rain0 [N,L] -> rain_all [N,L]."""
    n = inputs.shape[0]
    e = e_feats.shape[0]
    edge_dim = e_feats.shape[1]
    num_layers = e_feats.shape[2]
    scale = params["we"].shape[0]
    hidden = params["we"].shape[2]
    lp = _round_up(num_layers, 128)               # lane-dense output block

    # Embedding in plain XLA (too small to justify its own kernel launch).
    h0 = jnp.dot(inputs, params["w_emb"])

    # Layer axis leading so each time step's block is contiguous for the DMA.
    e_lad = jnp.transpose(e_feats, (2, 0, 1))             # [L, E, edge_dim]
    rain_lad = jnp.transpose(rain0, (1, 0))[..., None]    # [L, N, 1]

    rain_all = pl.pallas_call(
        _fused_eiconv_kernel,
        out_shape=jax.ShapeDtypeStruct((n, lp), jnp.float32),
        grid_spec=pltpu.PrefetchScalarGridSpec(
            num_scalar_prefetch=0,
            grid=(num_layers, scale),
            in_specs=[
                pl.BlockSpec((n, hidden), lambda l, s: (0, 0)),              # h0
                pl.BlockSpec((1, e, edge_dim), lambda l, s: (l, 0, 0)),      # e_feats
                pl.BlockSpec((1, n, 1), lambda l, s: (l, 0, 0)),             # rain
                pl.BlockSpec((e, n), lambda l, s: (0, 0)),                   # src one-hot
                pl.BlockSpec((n, e), lambda l, s: (0, 0)),                   # dst one-hot
                pl.BlockSpec((1, edge_dim, hidden), lambda l, s: (s, 0, 0)), # W_e stack
                pl.BlockSpec((1, hidden, hidden), lambda l, s: (s, 0, 0)),   # W_n stack
                pl.BlockSpec((hidden, 1), lambda l, s: (0, 0)),              # W_o (OUT)
            ],
            out_specs=pl.BlockSpec((n, lp), lambda l, s: (0, 0)),
            scratch_shapes=[pltpu.VMEM((n, hidden), jnp.float32)],           # h state
        ),
        compiler_params=pltpu.CompilerParams(
            dimension_semantics=("arbitrary", "arbitrary")),
    )(h0, e_lad, rain_lad, src_onehot, dst_onehot,
      params["we"], params["wn"], params["wo"])

    return rain_all[:, :num_layers]


# ----------------------------------------------------------------------------
# Params / graph construction + pure-JAX reference
# ----------------------------------------------------------------------------
def init_params(key, in_dim, num_hidden, edge_dim, scale):
    keys = jax.random.split(key, 4)
    sf = 0.1

    def norm(k, shape):
        return sf * jax.random.normal(k, shape, dtype=jnp.float32)

    # Weight stacks in application order: indices 0..scale-2 = IN layers
    # (out_on=False), index scale-1 = OUT layer (out_on=True).
    return {
        "w_emb": norm(keys[0], (in_dim, num_hidden)),
        "we": norm(keys[1], (scale, edge_dim, num_hidden)),
        "wn": norm(keys[2], (scale, num_hidden, num_hidden)),
        "wo": norm(keys[3], (num_hidden, 1)),
    }


def build_graph(n_nodes):
    # deterministic ring graph: each node sends to (i+1) and (i+2) mod N
    src, dst = [], []
    for i in range(n_nodes):
        src += [i, i]
        dst += [(i + 1) % n_nodes, (i + 2) % n_nodes]
    src = jnp.asarray(src, dtype=jnp.int32)
    dst = jnp.asarray(dst, dtype=jnp.int32)
    # 0/1 is exact in bf16; works on the MXU fast path of v5e/v6e/v7x.
    src_onehot = jax.nn.one_hot(src, n_nodes, dtype=jnp.bfloat16)      # [E, N]
    dst_onehot = jax.nn.one_hot(dst, n_nodes, dtype=jnp.bfloat16).T    # [N, E]
    return src_onehot, dst_onehot, src.shape[0]


def reference_forward(inputs, e_feats, rain0, params, src_onehot, dst_onehot):
    """Pure-JAX reference of the same reconstruction (for correctness check)."""
    src_f = src_onehot.astype(jnp.float32)
    dst_f = dst_onehot.astype(jnp.float32)
    num_layers = e_feats.shape[2]
    scale = params["we"].shape[0]
    h = inputs @ params["w_emb"]
    cols = []
    for l in range(num_layers):
        rain_m = None
        for s in range(scale):
            gate = jax.nn.sigmoid(e_feats[:, :, l] @ params["we"][s])
            msg = gate * (src_f @ h)
            agg = dst_f @ msg
            z = agg + rain0[:, l][:, None]
            h = jax.nn.relu(z @ params["wn"][s])
            if s == scale - 1:
                rain_m = h @ params["wo"]
        cols.append(rain_m)
    return jnp.concatenate(cols, axis=1)


if __name__ == "__main__":
    N = 16            # graph nodes
    IN_DIM = 4
    HIDDEN = 128      # lane-dense hidden dim (fills full 128-lane vregs / MXU cols)
    EDGE_DIM = 4
    NUM_LAYERS = 3    # time steps
    SCALE = 2         # -> one IN layer + one OUT layer

    key = jax.random.PRNGKey(0)
    k_param, k_x, k_e, k_r = jax.random.split(key, 4)

    src_onehot, dst_onehot, E = build_graph(N)
    params = init_params(k_param, IN_DIM, HIDDEN, EDGE_DIM, SCALE)

    inputs = jax.random.normal(k_x, (N, IN_DIM), dtype=jnp.float32)
    e_feats = jax.random.normal(k_e, (E, EDGE_DIM, NUM_LAYERS), dtype=jnp.float32)
    rain0 = jax.random.normal(k_r, (N, NUM_LAYERS), dtype=jnp.float32)

    rain_all = st_eiconv_net_forward(inputs, e_feats, rain0, params,
                                     src_onehot, dst_onehot)
    rain_all = jax.block_until_ready(rain_all)

    assert rain_all.shape == (N, NUM_LAYERS), rain_all.shape
    assert bool(jnp.all(jnp.isfinite(rain_all)))

    rain_ref = reference_forward(inputs, e_feats, rain0, params,
                                 src_onehot, dst_onehot)
    assert bool(jnp.allclose(rain_all, rain_ref, rtol=5e-2, atol=5e-2)), (
        float(jnp.max(jnp.abs(rain_all - rain_ref))))

    print("KERNEL_OK")
</pallas_src>

<mosaic_0001>
module attributes {stable_mosaic.version = 11 : i64} {
  func.func @_fused_eiconv_kernel(%arg0: i32, %arg1: i32, %arg2: memref<16x128xf32, #tpu.memory_space<vmem>>, %arg3: memref<1x32x4xf32, #tpu.memory_space<vmem>>, %arg4: memref<1x16x1xf32, #tpu.memory_space<vmem>>, %arg5: memref<32x16xbf16, #tpu.memory_space<vmem>>, %arg6: memref<16x32xbf16, #tpu.memory_space<vmem>>, %arg7: memref<1x4x128xf32, #tpu.memory_space<vmem>>, %arg8: memref<1x128x128xf32, #tpu.memory_space<vmem>>, %arg9: memref<128x1xf32, #tpu.memory_space<vmem>>, %arg10: memref<16x128xf32, #tpu.memory_space<vmem>>, %arg11: memref<16x128xf32, #tpu.memory_space<vmem>>) attributes {dimension_semantics = [#tpu.dimension_semantics<arbitrary>, #tpu.dimension_semantics<arbitrary>], iteration_bounds = array<i64: 3, 2>, scalar_prefetch = 0 : i64, scratch_operands = 1 : i64, tpu.core_type = #tpu.core_type<tc>, window_params = [{pipeline_mode = #tpu.pipeline_mode<synchronous>, transform_indices = @transform_0, window_bounds = array<i64: 16, 128>}, {transform_indices = @transform_1, window_bounds = array<i64: 1, 32, 4>}, {transform_indices = @transform_2, window_bounds = array<i64: 1, 16, 1>}, {pipeline_mode = #tpu.pipeline_mode<synchronous>, transform_indices = @transform_3, window_bounds = array<i64: 32, 16>}, {pipeline_mode = #tpu.pipeline_mode<synchronous>, transform_indices = @transform_4, window_bounds = array<i64: 16, 32>}, {transform_indices = @transform_5, window_bounds = array<i64: 1, 4, 128>}, {transform_indices = @transform_6, window_bounds = array<i64: 1, 128, 128>}, {pipeline_mode = #tpu.pipeline_mode<synchronous>, transform_indices = @transform_7, window_bounds = array<i64: 128, 1>}, {pipeline_mode = #tpu.pipeline_mode<synchronous>, transform_indices = @transform_8, window_bounds = array<i64: 16, 128>}]} {
    %c0_i32 = arith.constant 0 : i32
    %0 = arith.cmpi eq, %arg0, %c0_i32 : i32
    %c0_i32_0 = arith.constant 0 : i32
    %1 = arith.cmpi eq, %arg1, %c0_i32_0 : i32
    %2 = arith.andi %0, %1 : i1
    %3 = arith.extui %2 : i1 to i32
    %c0_i32_1 = arith.constant 0 : i32
    %4 = arith.cmpi ne, %3, %c0_i32_1 : i32
    scf.if %4 {
      %c0_27 = arith.constant 0 : index
      %c0_28 = arith.constant 0 : index
      %36 = vector.load %arg2[%c0_27, %c0_28] : memref<16x128xf32, #tpu.memory_space<vmem>>, vector<16x128xf32>
      %c0_29 = arith.constant 0 : index
      %c0_30 = arith.constant 0 : index
      %37 = vector.load %arg11[%c0_29, %c0_30] : memref<16x128xf32, #tpu.memory_space<vmem>>, vector<16x128xf32>
      tpu.vector_store %arg11[%c0_29, %c0_30], %36 {strides = array<i32>} : memref<16x128xf32, #tpu.memory_space<vmem>>, vector<16x128xf32>,
      %cst_31 = arith.constant 0.000000e+00 : f32
      %38 = vector.broadcast %cst_31 : f32 to vector<16x128xf32>
      %c0_32 = arith.constant 0 : index
      %c0_33 = arith.constant 0 : index
      %39 = vector.load %arg10[%c0_32, %c0_33] : memref<16x128xf32, #tpu.memory_space<vmem>>, vector<16x128xf32>
      tpu.vector_store %arg10[%c0_32, %c0_33], %38 {strides = array<i32>} : memref<16x128xf32, #tpu.memory_space<vmem>>, vector<16x128xf32>,
    } else {
    }
    %c0 = arith.constant 0 : index
    %c0_2 = arith.constant 0 : index
    %c0_3 = arith.constant 0 : index
    %5 = vector.load %arg3[%c0, %c0_2, %c0_3] : memref<1x32x4xf32, #tpu.memory_space<vmem>>, vector<1x32x4xf32>
    %6 = vector.shape_cast %5 : vector<1x32x4xf32> to vector<32x4xf32>
    %c0_4 = arith.constant 0 : index
    %c0_5 = arith.constant 0 : index
    %c0_6 = arith.constant 0 : index
    %7 = vector.load %arg7[%c0_4, %c0_5, %c0_6] : memref<1x4x128xf32, #tpu.memory_space<vmem>>, vector<1x4x128xf32>
    %8 = vector.shape_cast %7 : vector<1x4x128xf32> to vector<4x128xf32>
    %cst = arith.constant dense<0.000000e+00> : vector<32x128xf32>
    %9 = tpu.matmul %6, %8, %cst {dimension_numbers = #tpu.dot_dimension_numbers<[1], [0], [0], [1], [0, 0, 1, 1], [], []>} : vector<32x4xf32>, vector<4x128xf32>, vector<32x128xf32> -> vector<32x128xf32>
    %10 = arith.negf %9 : vector<32x128xf32>
    %11 = math.exp %10 : vector<32x128xf32>
    %cst_7 = arith.constant 1.000000e+00 : f32
    %12 = vector.broadcast %cst_7 : f32 to vector<32x128xf32>
    %13 = arith.addf %12, %11 : vector<32x128xf32>
    %14 = arith.divf %12, %13 : vector<32x128xf32>
    %c0_8 = arith.constant 0 : index
    %c0_9 = arith.constant 0 : index
    %15 = vector.load %arg5[%c0_8, %c0_9] : memref<32x16xbf16, #tpu.memory_space<vmem>>, vector<32x16xbf16>
    %16 = arith.extf %15 : vector<32x16xbf16> to vector<32x16xf32>
    %c0_10 = arith.constant 0 : index
    %c0_11 = arith.constant 0 : index
    %17 = vector.load %arg11[%c0_10, %c0_11] : memref<16x128xf32, #tpu.memory_space<vmem>>, vector<16x128xf32>
    %cst_12 = arith.constant dense<0.000000e+00> : vector<32x128xf32>
    %18 = tpu.matmul %16, %17, %cst_12 {dimension_numbers = #tpu.dot_dimension_numbers<[1], [0], [0], [1], [0, 0, 1, 1], [], []>} : vector<32x16xf32>, vector<16x128xf32>, vector<32x128xf32> -> vector<32x128xf32>
    %19 = arith.mulf %14, %18 : vector<32x128xf32>
    %c0_13 = arith.constant 0 : index
    %c0_14 = arith.constant 0 : index
    %20 = vector.load %arg6[%c0_13, %c0_14] : memref<16x32xbf16, #tpu.memory_space<vmem>>, vector<16x32xbf16>
    %21 = arith.extf %20 : vector<16x32xbf16> to vector<16x32xf32>
    %cst_15 = arith.constant dense<0.000000e+00> : vector<16x128xf32>
    %22 = tpu.matmul %21, %19, %cst_15 {dimension_numbers = #tpu.dot_dimension_numbers<[1], [0], [0], [1], [0, 0, 1, 1], [], []>} : vector<16x32xf32>, vector<32x128xf32>, vector<16x128xf32> -> vector<16x128xf32>
    %c0_16 = arith.constant 0 : index
    %c0_17 = arith.constant 0 : index
    %c0_18 = arith.constant 0 : index
    %23 = vector.load %arg4[%c0_16, %c0_17, %c0_18] : memref<1x16x1xf32, #tpu.memory_space<vmem>>, vector<1x16x1xf32>
    %24 = vector.shape_cast %23 : vector<1x16x1xf32> to vector<16x1xf32>
    %25 = vector.broadcast %24 : vector<16x1xf32> to vector<16x128xf32>
    %26 = arith.addf %22, %25 : vector<16x128xf32>
    %c0_19 = arith.constant 0 : index
    %c0_20 = arith.constant 0 : index
    %c0_21 = arith.constant 0 : index
    %27 = vector.load %arg8[%c0_19, %c0_20, %c0_21] : memref<1x128x128xf32, #tpu.memory_space<vmem>>, vector<1x128x128xf32>
    %28 = vector.shape_cast %27 : vector<1x128x128xf32> to vector<128x128xf32>
    %cst_22 = arith.constant dense<0.000000e+00> : vector<16x128xf32>
    %29 = tpu.matmul %26, %28, %cst_22 {dimension_numbers = #tpu.dot_dimension_numbers<[1], [0], [0], [1], [0, 0, 1, 1], [], []>} : vector<16x128xf32>, vector<128x128xf32>, vector<16x128xf32> -> vector<16x128xf32>
    %cst_23 = arith.constant 0.000000e+00 : f32
    %30 = vector.broadcast %cst_23 : f32 to vector<16x128xf32>
    %31 = arith.maximumf %29, %30 : vector<16x128xf32>
    %c0_24 = arith.constant 0 : index
    %c0_25 = arith.constant 0 : index
    %32 = vector.load %arg11[%c0_24, %c0_25] : memref<16x128xf32, #tpu.memory_space<vmem>>, vector<16x128xf32>
    tpu.vector_store %arg11[%c0_24, %c0_25], %31 {strides = array<i32>} : memref<16x128xf32, #tpu.memory_space<vmem>>, vector<16x128xf32>,
    %c1_i32 = arith.constant 1 : i32
    %33 = arith.cmpi eq, %arg1, %c1_i32 : i32
    %34 = arith.extui %33 : i1 to i32
    %c0_i32_26 = arith.constant 0 : i32
    %35 = arith.cmpi ne, %34, %c0_i32_26 : i32
    scf.if %35 {
      %c0_27 = arith.constant 0 : index
      %c0_28 = arith.constant 0 : index
      %36 = vector.load %arg9[%c0_27, %c0_28] : memref<128x1xf32, #tpu.memory_space<vmem>>, vector<128x1xf32>
      %cst_29 = arith.constant dense<0.000000e+00> : vector<16x1xf32>
      %37 = tpu.matmul %31, %36, %cst_29 {dimension_numbers = #tpu.dot_dimension_numbers<[1], [0], [0], [1], [0, 0, 1, 1], [], []>} : vector<16x128xf32>, vector<128x1xf32>, vector<16x1xf32> -> vector<16x1xf32>
      %38 = tpu.iota {dimensions = array<i32: 1>} : vector<16x128xi32>
      %39 = vector.broadcast %arg0 : i32 to vector<16x128xi32>
      %40 = arith.cmpi eq, %38, %39 : vector<16x128xi32>
      %c0_30 = arith.constant 0 : index
      %c0_31 = arith.constant 0 : index
      %41 = vector.load %arg10[%c0_30, %c0_31] : memref<16x128xf32, #tpu.memory_space<vmem>>, vector<16x128xf32>
      %42 = vector.shape_cast %37 : vector<16x1xf32> to vector<16x1xf32>
      %43 = vector.broadcast %42 : vector<16x1xf32> to vector<16x128xf32>
      %44 = arith.select %40, %43, %41 : vector<16x128xi1>, vector<16x128xf32>
      %c0_32 = arith.constant 0 : index
      %c0_33 = arith.constant 0 : index
      %45 = vector.load %arg10[%c0_32, %c0_33] : memref<16x128xf32, #tpu.memory_space<vmem>>, vector<16x128xf32>
      tpu.vector_store %arg10[%c0_32, %c0_33], %44 {strides = array<i32>} : memref<16x128xf32, #tpu.memory_space<vmem>>, vector<16x128xf32>,
    } else {
    }
    return
  }
  func.func @transform_0(%arg0: i32, %arg1: i32) -> (i32, i32) {
    %c0_i32 = arith.constant 0 : i32
    %c0_i32_0 = arith.constant 0 : i32
    %c0_i32_1 = arith.constant 0 : i32
    return %c0_i32, %c0_i32_0 : i32, i32
  }
  func.func @transform_1(%arg0: i32, %arg1: i32) -> (i32, i32, i32) {
    %c0_i32 = arith.constant 0 : i32
    %c0_i32_0 = arith.constant 0 : i32
    %c0_i32_1 = arith.constant 0 : i32
    return %arg0, %c0_i32, %c0_i32_0 : i32, i32, i32
  }
  func.func @transform_2(%arg0: i32, %arg1: i32) -> (i32, i32, i32) {
    %c0_i32 = arith.constant 0 : i32
    %c0_i32_0 = arith.constant 0 : i32
    %c0_i32_1 = arith.constant 0 : i32
    return %arg0, %c0_i32, %c0_i32_0 : i32, i32, i32
  }
  func.func @transform_3(%arg0: i32, %arg1: i32) -> (i32, i32) {
    %c0_i32 = arith.constant 0 : i32
    %c0_i32_0 = arith.constant 0 : i32
    %c0_i32_1 = arith.constant 0 : i32
    return %c0_i32, %c0_i32_0 : i32, i32
  }
  func.func @transform_4(%arg0: i32, %arg1: i32) -> (i32, i32) {
    %c0_i32 = arith.constant 0 : i32
    %c0_i32_0 = arith.constant 0 : i32
    %c0_i32_1 = arith.constant 0 : i32
    return %c0_i32, %c0_i32_0 : i32, i32
  }
  func.func @transform_5(%arg0: i32, %arg1: i32) -> (i32, i32, i32) {
    %c0_i32 = arith.constant 0 : i32
    %c0_i32_0 = arith.constant 0 : i32
    %c0_i32_1 = arith.constant 0 : i32
    return %arg1, %c0_i32, %c0_i32_0 : i32, i32, i32
  }
  func.func @transform_6(%arg0: i32, %arg1: i32) -> (i32, i32, i32) {
    %c0_i32 = arith.constant 0 : i32
    %c0_i32_0 = arith.constant 0 : i32
    %c0_i32_1 = arith.constant 0 : i32
    return %arg1, %c0_i32, %c0_i32_0 : i32, i32, i32
  }
  func.func @transform_7(%arg0: i32, %arg1: i32) -> (i32, i32) {
    %c0_i32 = arith.constant 0 : i32
    %c0_i32_0 = arith.constant 0 : i32
    %c0_i32_1 = arith.constant 0 : i32
    return %c0_i32, %c0_i32_0 : i32, i32
  }
  func.func @transform_8(%arg0: i32, %arg1: i32) -> (i32, i32) {
    %c0_i32 = arith.constant 0 : i32
    %c0_i32_0 = arith.constant 0 : i32
    %c0_i32_1 = arith.constant 0 : i32
    return %c0_i32, %c0_i32_0 : i32, i32
  }
}

</mosaic_0001>

<bundles_post_ra>
// kernel: st_eiconv_net_forward.1
= control target key start
LH: loop header
LB: loop body
LE: loop exit
PB: predicated region body
PF: predicated region fallthrough
CT: control target
= control target key end

     0   :  { %s1420_s27 = smov 0   ;;  %s1422_s28 = smov 0   ;;  %s1608_s0 = inlined_call_operand.vmem [shape: f32[16,128], index: 0, kind: input, shape index: {}]   ;;  %s1609_s1 = inlined_call_operand.vmem [shape: f32[3,32,4], index: 1, kind: input, shape index: {}]   ;;  %s1610_s2 = inlined_call_operand.vmem [shape: f32[3,16,1], index: 2, kind: input, shape index: {}]   ;;  %s1611_s3 = inlined_call_operand.vmem [shape: bf16[32,16], index: 3, kind: input, shape index: {}]   ;;  %s1612_s4 = inlined_call_operand.vmem [shape: bf16[16,32], index: 4, kind: input, shape index: {}]   ;;  %s1613_s5 = inlined_call_operand.vmem [shape: f32[2,4,128], index: 5, kind: input, shape index: {}]   ;;  %s1614_s6 = inlined_call_operand.vmem [shape: f32[2,128,128], index: 6, kind: input, shape index: {}]   ;;  %s1615_s7 = inlined_call_operand.vmem [shape: f32[128,1], index: 7, kind: input, shape index: {}]   ;;  %s1616_s8 = inlined_call_operand.vmem [shape: f32[16,128], index: 8, kind: output, shape index: {}]  }
   0x1   :  { %s1424_s29 = smov 0   ;;  %s1426_s30 = smov 0  }
   0x2   :  { %s1428_s9 = smov 0  }
   0x3 LB: > { %s27_s10 = sadd.s32 1, %s1362_s29  ;;  %s30_s11 = sadd.s32 1, %s1366_s30  ;;  %s1370_s9 = sphi %s1428_s9, %s18_s9   ;;  %s1366_s30 = sphi %s1426_s30, %s1624_s30   ;;  %s1362_s29 = sphi %s1424_s29, %s1623_s29   ;;  %s1358_s28 = sphi %s1422_s28, %s1622_s28   ;;  %s1354_s27 = sphi %s1420_s27, %s1621_s27  }
   0x4   : > { %p28_p0 = scmp.ge.s32.totalorder %s27_s10, 2  ;;  %p1001_p1 = scmp.ge.s32.totalorder %s1370_s9, 1 }
   0x5   : > { %p298_p2 = scmp.lt.s32.totalorder %s1370_s9, 7 }
   0x6   : > { %s1626_s10 = smov (%p28_p0, %s27_s10), 0  ;;  %s1628_s11 = smov (!%p28_p0, %s30_s11), %s1366_s30 }
   0x7   : > { %1617 = sst [smem:[#allocation3_spill]] %s1626_s10  ;;  %p299_p3 = pnand %p1001_p1, %p298_p2 }
   0x8   : > { %p32_p4 = scmp.ge.s32.totalorder %s1628_s11, 3  ;;  %p341_p5 = scmp.lt.s32.totalorder (!%p299_p3), %s1358_s28, 2 }
   0x9   : > { %302 = sbr.rel (%p299_p3) target bundleno = 1062 (0x426), region = 52  ;;  %p351_p6 = scmp.lt.s32.totalorder (!%p299_p3), %s1354_s27, 1 }
   0xa   : > { %s1630_s11 = smov (%p32_p4, %s1628_s11), 0  ;;  %p360_p7 = scmp.eq.s32.totalorder (!%p299_p3), %s1358_s28, 0 }
   0xb   : > { %1618 = sst [smem:[#allocation4_spill]] %s1630_s11  ;;  %p361_p8 = scmp.eq.s32.totalorder (!%p299_p3), %s1354_s27, 0 }
   0xd   : > { %p362_p9 = pnand (!%p299_p3), %p361_p8, %p360_p7 }
  0x10   : > { %s342_s12 = scalar_select %p341_p5, %s1358_s28, 2 }
  0x11   : > { %s352_s13 = scalar_select %p351_p6, %s1354_s27, 1 }
  0x12   : > { %s1027_s14 = sshll.u32 %s342_s12, 5  ;;  %s1028_s15 = sshll.u32 %s342_s12, 4  ;;  %v366_v0 = vld [vmem:[%s1608_s0] sm:$0xff] (!%p362_p9)  ;;  %v367_v1 = vld [vmem:[%s1608_s0 + $0x8] sm:$0xff] (!%p362_p9)  ;;  %v1372_v2 = vmov (!%p362_p9), 0.0  }
  0x13   : > { %s1463_s18 = scalar_lea.vmem %s1609_s1, %s1027_s14  ;;  %s1468_s21 = scalar_lea.vmem %s1610_s2, %s1028_s15  ;;  %368 = vst [vmem:[#allocation2] sm:$0xff] (!%p362_p9), %v366_v0  ;;  %369 = vst [vmem:[#allocation2 + $0x8] sm:$0xff] (!%p362_p9), %v367_v1 }
  0x14   : > { %s1006_s22 = sshll.u32 %s352_s13, 2  ;;  %s1029_s23 = sshll.u32 %s352_s13, 7  ;;  %370 = vst [vmem:[%s1616_s8] sm:$0xff] (!%p362_p9), %v1372_v2  ;;  %371 = vst [vmem:[%s1616_s8 + $0x8] sm:$0xff] (!%p362_p9), %v1372_v2 }
  0x15   : > { %s354_s26 = scalar_lea.vmem %s1613_s5, %s1006_s22  ;;  %s1476_s12 = scalar_lea.vmem %s1614_s6, %s1029_s23 }
  0x16   : > { %365 = sbr.rel (%p362_p9) target bundleno = 29 (0x1d), region = 56 }
  0x1d PF: > { %v376_v3 = vld [vmem:[%s354_s26] sm:$0xf]  ;;  %vm390_vm0 = vcmask 1043456   ;;  %vm377_vm1 = vcmask 31744   ;;  %v373_v5 = vld [vmem:[%s1463_s18 + $0x8] sm:$0xff]  ;;  %v374_v6 = vld [vmem:[%s1463_s18 + $0x10] sm:$0xff] }
  0x1e   : > { %v372_v4 = vld [vmem:[%s1463_s18] sm:$0xff]  ;;  %1096 = vmatprep.subr.msk.mxu0 %vm390_vm0, %v376_v3  ;;  %v512_v8 = vld [vmem:[#allocation2 + $0x8] sm:$0xff]  ;;  %v375_v11 = vld [vmem:[%s1463_s18 + $0x18] sm:$0xff]  ;;  %vm513_vm2 = vcmask 130048   ;;  %vm631_vm3 = vcmask 261120   ;;  %v1373_v21 = vmov 0  }
  0x1f   : > { %1098 = vmatprep.mubr.msk.f32.mxu0 %vm377_vm1, %v372_v4  ;;  %v511_v7 = vld [vmem:[#allocation2] sm:$0xff]  ;;  %1097 = vmatpush3.msk.msra.mxu0 %vm390_vm0, %v376_v3  ;;  %v1042_v13 = vld [vmem:[%s1611_s3 + $0x8] sm:$0xff]   ;;  %v715_v23 = vld [vmem:[%s1476_s12 + $0x10] sm:$0xff]  ;;  %p1024_p10 = scmp.ne.s32.totalorder %s1354_s27, 1 }
  0x20   : > { %v1031_v9 = vld [vmem:[%s1611_s3] sm:$0xff]   ;;  %1099 = vmatmul.mubr.msk.f32.vlgmr.msra.gmra.mrb[0].mxu0 %vm377_vm1, %v373_v5  ;;  %v1195_v10 = vpack.c.bf16 %v512_v8, %v511_v7  ;;  %v1036_v15 = vunpack.c.l.bf16 %v1042_v13  ;;  %v1037_v16 = vunpack.c.h.bf16 %v1042_v13  ;;  %1314 = vset.pattern.permute.xlu0 %v1373_v21  ;;  %v714_v22 = vld [vmem:[%s1476_s12 + $0x8] sm:$0xff]  ;;  %v716_v24 = vld [vmem:[%s1476_s12 + $0x18] sm:$0xff] }
  0x21   : > { %1101 = vmatprep.mubr.msk.f32.mxu0 %vm377_vm1, %v374_v6  ;;  %v1032_v12 = vunpack.c.l.bf16 %v1031_v9  ;;  %v1033_v14 = vunpack.c.h.bf16 %v1031_v9  ;;  %v1507_v17 = vld [vmem:[%s1612_s4] sm:$0xff]   ;;  %v1211_v26 = vpack.c.bf16 %v716_v24, %v715_v23  ;;  %v620_v27 = vld [vmem:[%s1468_s21 + $0x8] sm:$0xff]  ;;  %v719_v31 = vld [vmem:[%s1476_s12 + $0x30] sm:$0xff] }
  0x22   : > { %1196 = vmatprep.subr.bf16.mxu0 %v1195_v10  ;;  %v1040_v18 = vunpack.c.l.bf16 %v1507_v17  ;;  %v619_v19 = vld [vmem:[%s1468_s21] sm:$0xff]  ;;  %v718_v29 = vld [vmem:[%s1476_s12 + $0x28] sm:$0xff]  ;;  %v720_v32 = vld [vmem:[%s1476_s12 + $0x38] sm:$0xff]  ;;  %v1041_v9 = vunpack.c.h.bf16 %v1507_v17 }
  0x23   : > { %1198 = vmatpush3.bf16.msra.mxu0 %v1195_v10  ;;  %v713_v20 = vld [vmem:[%s1476_s12] sm:$0xff]  ;;  %623 = vperm.xlu0 %1314, %v619_v19   ;;  %v1219_v33 = vpack.c.bf16 %v720_v32, %v719_v31  ;;  %v722_v35 = vld [vmem:[%s1476_s12 + $0x48] sm:$0xff]  ;;  %v723_v37 = vld [vmem:[%s1476_s12 + $0x50] sm:$0xff] }
  0x24   : > { %1102 = vmatmul.mubr.msk.f32.gmra.mrb[2].mxu0 %vm377_vm1, %v375_v11  ;;  %v1207_v25 = vpack.c.bf16 %v714_v22, %v713_v20  ;;  %v717_v28 = vld [vmem:[%s1476_s12 + $0x20] sm:$0xff]  ;;  %v724_v38 = vld [vmem:[%s1476_s12 + $0x58] sm:$0xff]  ;;  %v726_v41 = vld [vmem:[%s1476_s12 + $0x68] sm:$0xff] }
  0x25   : > { %1108 = vmatprep.mubr.msk.f32.mxu0 %vm513_vm2, %v1032_v12  ;;  %v1215_v30 = vpack.c.bf16 %v718_v29, %v717_v28  ;;  %v721_v34 = vld [vmem:[%s1476_s12 + $0x40] sm:$0xff]  ;;  %v1227_v39 = vpack.c.bf16 %v724_v38, %v723_v37  ;;  %v727_v10 = vld [vmem:[%s1476_s12 + $0x70] sm:$0xff]  ;;  %v728_v11 = vld [vmem:[%s1476_s12 + $0x78] sm:$0xff] }
  0x26   : > { %1208 = vmatprep.subr.bf16.mxu1 %v1207_v25  ;;  %v1223_v36 = vpack.c.bf16 %v722_v35, %v721_v34  ;;  %v725_v40 = vld [vmem:[%s1476_s12 + $0x60] sm:$0xff]  ;;  %v1235_v12 = vpack.c.bf16 %v728_v11, %v727_v10  ;;  %v813_v24 = vld [vmem:[%s1615_s7 + $0x8] sm:$0xff] (!%p1024_p10)  ;;  %v818_v32 = vld [vmem:[%s1615_s7 + $0x30] sm:$0xff] (!%p1024_p10) }
  0x27   : > { %1210 = vmatpush3.bf16.msra.mxu1 %v1207_v25  ;;  %628 = vperm.xlu0 %1314, %v620_v27   ;;  %v1231_v42 = vpack.c.bf16 %v726_v41, %v725_v40  ;;  %v812_v23 = vld [vmem:[%s1615_s7] sm:$0xff] (!%p1024_p10)  ;;  %v814_v25 = vld [vmem:[%s1615_s7 + $0x10] sm:$0xff] (!%p1024_p10)  ;;  %v815_v27 = vld [vmem:[%s1615_s7 + $0x18] sm:$0xff] (!%p1024_p10) }
  0x28   : > { %1109 = vmatmul.mubr.msk.f32.vlgmr.msra.gmra.mrb[4].mxu0 %vm513_vm2, %v1033_v14  ;;  %1212 = vmatprep.subr.bf16.mxu1 %v1211_v26  ;;  %v1243_v28 = vpack.c.bf16 (!%p1024_p10), %v815_v27, %v814_v25  ;;  %v816_v29 = vld [vmem:[%s1615_s7 + $0x20] sm:$0xff] (!%p1024_p10)  ;;  %v822_v38 = vld [vmem:[%s1615_s7 + $0x50] sm:$0xff] (!%p1024_p10) }
  0x29   : > { %1111 = vmatprep.mubr.msk.f32.mxu0 %vm513_vm2, %v1036_v15  ;;  %v820_v35 = vld [vmem:[%s1615_s7 + $0x40] sm:$0xff] (!%p1024_p10) }
  0x2a   : > { %v824_v41 = vld [vmem:[%s1615_s7 + $0x60] sm:$0xff] (!%p1024_p10) }
  0x2b   : > { %1214 = vmatpush3.bf16.msra.mxu1 %v1211_v26  ;;  %v1239_v26 = vpack.c.bf16 (!%p1024_p10), %v813_v24, %v812_v23 }
  0x2c   : > { %1112 = vmatmul.mubr.msk.f32.gmra.mrb[6].mxu0 %vm513_vm2, %v1037_v16  ;;  %1216 = vmatprep.subr.bf16.mxu1 %v1215_v30 }
  0x2d   : > { %1122 = vmatprep.mubr.msk.f32.mxu0 %vm631_vm3, %v1040_v18 }
  0x2f   : > { %1218 = vmatpush3.bf16.msra.mxu1 %v1215_v30  ;;  %v817_v30 = vld [vmem:[%s1615_s7 + $0x28] sm:$0xff] (!%p1024_p10) }
  0x30   : > { %1220 = vmatprep.subr.bf16.mxu1 %v1219_v33  ;;  %v1247_v31 = vpack.c.bf16 (!%p1024_p10), %v817_v30, %v816_v29 }
  0x33   : > { %1222 = vmatpush3.bf16.msra.mxu1 %v1219_v33  ;;  %v819_v33 = vld [vmem:[%s1615_s7 + $0x38] sm:$0xff] (!%p1024_p10) }
  0x34   : > { %1224 = vmatprep.subr.bf16.mxu1 %v1223_v36  ;;  %v1251_v34 = vpack.c.bf16 (!%p1024_p10), %v819_v33, %v818_v32 }
  0x37   : > { %1226 = vmatpush3.bf16.msra.mxu1 %v1223_v36  ;;  %v821_v36 = vld [vmem:[%s1615_s7 + $0x48] sm:$0xff] (!%p1024_p10) }
  0x38   : > { %1228 = vmatprep.subr.bf16.mxu1 %v1227_v39  ;;  %v1255_v37 = vpack.c.bf16 (!%p1024_p10), %v821_v36, %v820_v35 }
  0x3b   : > { %1230 = vmatpush3.bf16.msra.mxu1 %v1227_v39  ;;  %v823_v39 = vld [vmem:[%s1615_s7 + $0x58] sm:$0xff] (!%p1024_p10) }
  0x3c   : > { %1232 = vmatprep.subr.bf16.mxu1 %v1231_v42  ;;  %v1259_v40 = vpack.c.bf16 (!%p1024_p10), %v823_v39, %v822_v38 }
  0x3f   : > { %1234 = vmatpush3.bf16.msra.mxu1 %v1231_v42  ;;  %v825_v42 = vld [vmem:[%s1615_s7 + $0x68] sm:$0xff] (!%p1024_p10) }
  0x40   : > { %1236 = vmatprep.subr.bf16.mxu1 %v1235_v12 }
  0x43   : > { %1238 = vmatpush3.bf16.msra.mxu1 %v1235_v12 }
  0xa2   : > { %v624_v13 = vpop.permute.xlu0 %623 }
  0xa6   : > { %v629_v16 = vpop.permute.xlu0 %628 }
  0xf3   : > { %v1100_v43 = vpop.f32.mrb[0].mxu0 }
  0xf4   : > { %v1015_v44 = vmul.f32 -1.442695, %v1100_v43  ;;  %v460_v45 = vpop.f32.mrb[1].mxu0  ;;  %v1263_v43 = vpack.c.bf16 (!%p1024_p10), %v825_v42, %v824_v41 }
  0xf5   : > { %v1014_v46 = vmul.f32 -1.442695, %v460_v45  ;;  %v827_v45 = vld [vmem:[%s1615_s7 + $0x78] sm:$0xff] (!%p1024_p10) }
  0xf6   : > { %1315 = vpow2.f32 %v1015_v44  ;;  %v826_v44 = vld [vmem:[%s1615_s7 + $0x70] sm:$0xff] (!%p1024_p10) }
  0xf7   : > { %1317 = vpow2.f32 %v1014_v46  ;;  %v1103_v47 = vpop.f32.mrb[2].mxu0  ;;  %v1267_v46 = vpack.c.bf16 (!%p1024_p10), %v827_v45, %v826_v44 }
  0xf8   : > { %v1017_v48 = vmul.f32 -1.442695, %v1103_v47  ;;  %v470_v49 = vpop.f32.mrb[3].mxu0  ;;  %v1374_v47 = vmov (!%p1024_p10), 0  }
  0xf9   : > { %v1016_v50 = vmul.f32 -1.442695, %v470_v49  ;;  %1331 = vset.pattern.permute.xlu0 (!%p1024_p10), %v1374_v47 }
  0xfa   : > { %1319 = vpow2.f32 %v1017_v48 }
  0xfb   : > { %1321 = vpow2.f32 %v1016_v50  ;;  %v1110_v51 = vpop.f32.mrb[4].mxu0  ;;  %v903_v50 = vlaneseq (!%p1024_p10) }
  0xfc   : > { %v592_v52 = vpop.f32.mrb[5].mxu0 }
  0xff   : > { %v1113_v53 = vpop.f32.mrb[6].mxu0 }
 0x100   : > { %v1316_v54 = vpop.eup %1315  ;;  %v602_v55 = vpop.f32.mrb[7].mxu0 }
 0x101   : > { %v1318_v56 = vpop.eup %1317  ;;  %v492_v57 = vadd.f32 1.0, %v1316_v54 }
 0x102   : > { %v491_v58 = vadd.f32 1.0, %v1318_v56  ;;  %v908_v56 = vld [vmem:[%s1616_s8 + $0x8] sm:$0xff] (!%p1024_p10) }
 0x103   : > { %1323 = vrcp.f32 %v492_v57 }
 0x104   : > { %v1320_v59 = vpop.eup %1319  ;;  %1325 = vrcp.f32 %v491_v58 }
 0x105   : > { %v1322_v60 = vpop.eup %1321  ;;  %v494_v61 = vadd.f32 1.0, %v1320_v59 }
 0x106   : > { %v493_v62 = vadd.f32 1.0, %v1322_v60 }
 0x107   : > { %1327 = vrcp.f32 %v494_v61 }
 0x108   : > { %1329 = vrcp.f32 %v493_v62 }
 0x10d   : > { %v1324_v63 = vpop.eup %1323 }
 0x10e   : > { %v1326_v0 = vpop.eup %1325  ;;  %v612_v1 = vmul.f32 %v1324_v63, %v1110_v51  ;;  %v904_v51 = vand.u32 (!%p1024_p10), 127, %v903_v50 }
 0x10f   : > { %v611_v2 = vmul.f32 %v1326_v0, %v592_v52  ;;  %v905_v52 = vstv (!%p1024_p10), %s1358_s28 }
 0x110   : > { %vm906_vm4 = vcmp.eq.s32.totalorder (!%p1024_p10), %v904_v51, %v905_v52 }
 0x111   : > { %v1328_v3 = vpop.eup %1327  ;;  %v1199_v4 = vpack.c.bf16 %v612_v1, %v611_v2 }
 0x112   : > { %v1330_v5 = vpop.eup %1329  ;;  %v614_v6 = vmul.f32 %v1328_v3, %v1113_v53  ;;  %v907_v53 = vld [vmem:[%s1616_s8] sm:$0xff] (!%p1024_p10) }
 0x113   : > { %v613_v7 = vmul.f32 %v1330_v5, %v602_v55  ;;  %1200 = vmatprep.subr.bf16.mxu0 %v1199_v4 }
 0x114   : > { %1202 = vmatpush3.bf16.msra.mxu0 %v1199_v4 }
 0x115   : > { %v1203_v8 = vpack.c.bf16 %v614_v6, %v613_v7 }
 0x117   : > { %1204 = vmatprep.subr.bf16.mxu0 %v1203_v8 }
 0x118   : > { %1206 = vmatpush3.bf16.msra.mxu0 %v1203_v8 }
 0x119   : > { %1240 = vmatprep.subr.bf16.mxu0 (!%p1024_p10), %v1239_v26 }
 0x11b   : > { %1123 = vmatmul.mubr.msk.f32.vlgmr.msra.gmra.mrb[8].mxu0 %vm631_vm3, %v1041_v9 }
 0x11c   : > { %1242 = vmatpush3.bf16.msra.mxu0 (!%p1024_p10), %v1239_v26 }
 0x11d   : > { %1244 = vmatprep.subr.bf16.mxu0 (!%p1024_p10), %v1243_v28 }
 0x120   : > { %1246 = vmatpush3.bf16.msra.mxu0 (!%p1024_p10), %v1243_v28 }
 0x121   : > { %1248 = vmatprep.subr.bf16.mxu0 (!%p1024_p10), %v1247_v31 }
 0x124   : > { %1250 = vmatpush3.bf16.msra.mxu0 (!%p1024_p10), %v1247_v31 }
 0x125   : > { %1252 = vmatprep.subr.bf16.mxu0 (!%p1024_p10), %v1251_v34 }
 0x128   : > { %1254 = vmatpush3.bf16.msra.mxu0 (!%p1024_p10), %v1251_v34 }
 0x129   : > { %1256 = vmatprep.subr.bf16.mxu0 (!%p1024_p10), %v1255_v37 }
 0x12c   : > { %1258 = vmatpush3.bf16.msra.mxu0 (!%p1024_p10), %v1255_v37 }
 0x12d   : > { %1260 = vmatprep.subr.bf16.mxu0 (!%p1024_p10), %v1259_v40 }
 0x130   : > { %1262 = vmatpush3.bf16.msra.mxu0 (!%p1024_p10), %v1259_v40 }
 0x131   : > { %1264 = vmatprep.subr.bf16.mxu0 (!%p1024_p10), %v1263_v43 }
 0x134   : > { %1266 = vmatpush3.bf16.msra.mxu0 (!%p1024_p10), %v1263_v43 }
 0x135   : > { %1268 = vmatprep.subr.bf16.mxu0 (!%p1024_p10), %v1267_v46 }
 0x138   : > { %1270 = vmatpush3.bf16.msra.mxu0 (!%p1024_p10), %v1267_v46 }
 0x1ee   : > { %v1124_v14 = vpop.f32.mrb[8].mxu0 }
 0x1ef   : > { %v704_v15 = vpop.f32.mrb[9].mxu0  ;;  %v710_v19 = vadd.f32 %v1124_v14, %v629_v16 }
 0x1f0   : > { %v705_v18 = vadd.f32 %v704_v15, %v624_v13 }
 0x1f2   : > { %1157 = vmatprep.mubr.f32.mxu1 %v705_v18 }
 0x1f3   : > { %1158 = vmatmul.mubr.f32.vlgmr.msra.gmra.mrb[0].mxu1 %v710_v19 }
 0x2c4   : > { %811 = sbr.rel (%p1024_p10) target bundleno = 1062 (0x426), region = 60 }
 0x2c6   : > { %v1159_v20 = vpop.f32.mrb[0].mxu1 }
 0x2c7   : > { %v805_v21 = vmax.f32 %v1159_v20, 0.0  ;;  %v795_v22 = vpop.f32.mrb[1].mxu1 }
 0x2c8   : > { %v804_v17 = vmax.f32 %v795_v22, 0.0 }
 0x2c9   : > { %807 = vst [vmem:[#allocation2 + $0x8] sm:$0xff] %v805_v21 }
 0x2ca   : > { %806 = vst [vmem:[#allocation2] sm:$0xff] %v804_v17  ;;  %1192 = vmatprep.mubr.f32.mxu0 (!%p1024_p10), %v804_v17 }
 0x2cb   : > { %1193 = vmatmul.mubr.f32.vlgmr.msra.gmra.mrb[0].mxu0 %v805_v21 }
 0x39e   : > { %v1194_v48 = vpop.f32.mrb[0].mxu0 }
 0x39f   : > { %v894_v49 = vpop.f32.mrb[1].mxu0 }
 0x3a0   : > { %911 = vperm.xlu0 %1331, %v894_v49  }
 0x3a4   : > { %916 = vperm.xlu0 %1331, %v1194_v48  }
 0x41f   : > { %v912_v54 = vpop.permute.xlu0 %911 }
 0x420   : > { %v919_v55 = vsel %vm906_vm4, %v912_v54, %v907_v53 }
 0x421   : > { %921 = vst [vmem:[%s1616_s8] sm:$0xff] %v919_v55 }
 0x423   : > { %v917_v57 = vpop.permute.xlu0 %916 }
 0x424   : > { %v920_v58 = vsel %vm906_vm4, %v917_v57, %v908_v56 }
 0x425   : > { %922 = vst [vmem:[%s1616_s8 + $0x8] sm:$0xff] %v920_v58 }
 0x426 PF: > { %s18_s9 = sadd.s32 1, %s1370_s9   ;;  %s1619_s16 = sld [smem:[#allocation3_spill]] }
 0x427   : > { %p15_p11 = scmp.ge.s32.totalorder %s18_s9, 8   ;;  %s1620_s17 = sld [smem:[#allocation4_spill]] }
 0x428   : > { %s1621_s27 = smov %s1362_s29  ;;  %s1622_s28 = smov %s1366_s30 }
 0x429   :  { %17 = sbr.rel (!%p15_p11) target bundleno = 3 (0x3), region = 95 }
 0x42c   : > { %s1623_s29 = smov %s1619_s16 }
 0x42d   : > { %s1624_s30 = smov %s1620_s17 }

</bundles_post_ra>
